<compile_context>
chip_gen: v7x
topology: tpu7x:2x2x1
jax: 0.10.0
libtpu: 0.0.40
codegen_flags: <defaults>
</compile_context>

<pallas_src>
import jax
import jax.numpy as jnp
from jax.experimental import pallas as pl


def _model_kernel(x2d_ref, x3d_ref, o_ref):
    # x2d_ref: (B, C)    rows (index j) on sublanes, C on lanes -> tanh(cat) source
    # x3d_ref: (B, C, 1) C on sublanes, lane dim of size 1       -> the `+ x` addend
    # o_ref:   (B, C, 3C)
    x2d = x2d_ref[...]

    y1 = x2d * 2.0
    t1 = jnp.tanh(y1)            # computed once, reused for cat parts 0 and 2
    t2 = jnp.tanh(y1 + 3.0)

    # tcat[j, k] = tanh(cat([2x, 2x+3, 2x], axis=-1))[j, k]   -> (C, 3C)
    tcat = jnp.concatenate([t1, t2, t1], axis=-1)

    # out[i, j, k] = tcat[j, k] + x[i, j, 0]
    # x3d_ref[...] is (B, C, 1): broadcasting its size-1 lane axis to 3C lanes
    # is free; tcat[None] broadcasts along the leading (non-tiled) axis.
    o_ref[...] = tcat[None, :, :] + x3d_ref[...]


def model_forward(x):
    """x: (B, C, 1) float32 with B == C (the only case where the torch forward is defined)."""
    B, C, D = x.shape
    assert D == 1, "last dim must be 1 so torch's .view(shape[:-1]) is a valid view"
    assert B == C, "B must equal C so the final broadcast `tanh(...) + x` is valid"

    x2d = x[..., 0]  # (B, C); removing a trailing size-1 dim is a metadata-only reshape

    # Single-step kernel: no grid, full arrays as VMEM blocks (inputs ~1 KiB each,
    # output B*C*3C*4 bytes = 48 KiB at B=C=16 -- far below any VMEM limit).
    return pl.pallas_call(
        _model_kernel,
        out_shape=jax.ShapeDtypeStruct((B, C, 3 * C), x.dtype),
    )(x2d, x)


def _reference(x):
    # Pure-JAX replica of the torch forward (same broadcasting semantics).
    y1 = x * 2.0
    y2 = y1 + 3.0
    y3 = jnp.concatenate([y1, y2, y1], axis=1)   # (B, 3C, 1)
    y3 = y3.reshape(y3.shape[:-1])               # (B, 3C)
    y3 = jnp.tanh(y3)
    return y3 + x                                # -> (B, C, 3C)


if __name__ == "__main__":
    B = C = 16                                   # small, B == C, trailing dim 1
    key = jax.random.PRNGKey(0)
    x = jax.random.normal(key, (B, C, 1), dtype=jnp.float32)

    out = model_forward(x)
    out = jax.block_until_ready(out)

    ref = _reference(x)
    assert out.shape == ref.shape == (B, C, 3 * C), (out.shape, ref.shape)
    assert jnp.allclose(out, ref, atol=1e-5, rtol=1e-5), "mismatch vs reference"

    print("KERNEL_OK")
</pallas_src>

<mosaic_0001>
module attributes {stable_mosaic.version = 11 : i64} {
  func.func @_model_kernel(%arg0: memref<16x16xf32, #tpu.memory_space<vmem>>, %arg1: memref<16x16x1xf32, #tpu.memory_space<vmem>>, %arg2: memref<16x16x48xf32, #tpu.memory_space<vmem>>) attributes {dimension_semantics = [], scalar_prefetch = 0 : i64, scratch_operands = 0 : i64, tpu.core_type = #tpu.core_type<tc>} {
    %c0 = arith.constant 0 : index
    %c0_0 = arith.constant 0 : index
    %0 = vector.load %arg0[%c0, %c0_0] : memref<16x16xf32, #tpu.memory_space<vmem>>, vector<16x16xf32>
    %cst = arith.constant 2.000000e+00 : f32
    %1 = vector.broadcast %cst : f32 to vector<16x16xf32>
    %2 = arith.mulf %0, %1 : vector<16x16xf32>
    %3 = math.tanh %2 : vector<16x16xf32>
    %cst_1 = arith.constant 3.000000e+00 : f32
    %4 = vector.broadcast %cst_1 : f32 to vector<16x16xf32>
    %5 = arith.addf %2, %4 : vector<16x16xf32>
    %6 = math.tanh %5 : vector<16x16xf32>
    %7 = tpu.concatenate %3, %6, %3 in 1 : vector<16x16xf32>, vector<16x16xf32>, vector<16x16xf32> -> vector<16x48xf32>
    %8 = vector.shape_cast %7 : vector<16x48xf32> to vector<1x16x48xf32>
    %c0_2 = arith.constant 0 : index
    %c0_3 = arith.constant 0 : index
    %c0_4 = arith.constant 0 : index
    %9 = vector.load %arg1[%c0_2, %c0_3, %c0_4] : memref<16x16x1xf32, #tpu.memory_space<vmem>>, vector<16x16x1xf32>
    %10 = vector.broadcast %8 : vector<1x16x48xf32> to vector<16x16x48xf32>
    %11 = vector.broadcast %9 : vector<16x16x1xf32> to vector<16x16x48xf32>
    %12 = arith.addf %10, %11 : vector<16x16x48xf32>
    %c0_5 = arith.constant 0 : index
    %c0_6 = arith.constant 0 : index
    %c0_7 = arith.constant 0 : index
    %13 = vector.load %arg2[%c0_5, %c0_6, %c0_7] : memref<16x16x48xf32, #tpu.memory_space<vmem>>, vector<16x16x48xf32>
    tpu.vector_store %arg2[%c0_5, %c0_6, %c0_7], %12 {strides = array<i32>} : memref<16x16x48xf32, #tpu.memory_space<vmem>>, vector<16x16x48xf32>,
    return
  }
}

</mosaic_0001>

<bundles_post_ra>
// kernel: tpu_custom_call.1
= control target key start
LH: loop header
LB: loop body
LE: loop exit
PB: predicated region body
PF: predicated region fallthrough
CT: control target
= control target key end

     0   :  { %v357_v2 = vmov 0   ;;  %s568_s0 = inlined_call_operand.vmem [shape: f32[16,16], index: 0, kind: input, shape index: {}]   ;;  %s569_s1 = inlined_call_operand.vmem [shape: f32[16,16,1], index: 1, kind: input, shape index: {}]   ;;  %s570_s2 = inlined_call_operand.hbm [shape: f32[16,16,48], index: 2, kind: output, shape index: {}]  }
   0x1   :  { %v45_v0 = vld [vmem:[%s569_s1 + $0x8] sm:$0xff]  ;;  %v44_v1 = vld [vmem:[%s569_s1] sm:$0xff]  ;;  %324 = vset.pattern.permute.xlu1 %v357_v2  ;;  %323 = vset.pattern.permute.xlu0 %v357_v2  ;;  %v46_v7 = vld [vmem:[%s569_s1 + $0x10] sm:$0xff] }
   0x2   :  { %v12_v3 = vld [vmem:[%s568_s0] sm:$0xff]  ;;  %v13_v4 = vld [vmem:[%s568_s0 + $0x8] sm:$0xff]  ;;  %83 = vperm.xlu1 %324, %v45_v0   ;;  %78 = vperm.xlu0 %323, %v44_v1   ;;  %v47_v8 = vld [vmem:[%s569_s1 + $0x18] sm:$0xff] }
   0x3   :  { %v14_v5 = vmul.f32 2.0, %v12_v3  ;;  %v15_v6 = vmul.f32 2.0, %v13_v4 }
   0x5   :  { %325 = vtanh.f32 %v14_v5  ;;  %v18_v9 = vadd.f32 3.0, %v14_v5  ;;  %v19_v10 = vadd.f32 3.0, %v15_v6 }
   0x6   :  { %327 = vtanh.f32 %v15_v6  ;;  %88 = vperm.xlu1 %324, %v46_v7   ;;  %93 = vperm.xlu0 %323, %v47_v8  }
   0x7   :  { %329 = vtanh.f32 %v18_v9 }
   0x8   :  { %331 = vtanh.f32 %v19_v10 }
   0x9   :  { %7 = vsyncpa [#allocation3], 0  ;;  %s358_s0 = smov 32   ;;  %s359_s21 = smov 16   ;;  %v48_v15 = vld [vmem:[%s569_s1 + $0x20] sm:$0xff]  ;;  %v49_v16 = vld [vmem:[%s569_s1 + $0x28] sm:$0xff] }
   0xa   :  { %v50_v17 = vld [vmem:[%s569_s1 + $0x30] sm:$0xff]  ;;  %v51_v18 = vld [vmem:[%s569_s1 + $0x38] sm:$0xff]  ;;  %v52_v19 = vld [vmem:[%s569_s1 + $0x40] sm:$0xff]  ;;  %vm38_vm0 = vcmask 130048   ;;  %vm41_vm1 = vcmask 261120   ;;  %vm268_vm2 = vcmask 392192  }
   0xb   :  { %v53_v20 = vld [vmem:[%s569_s1 + $0x48] sm:$0xff]  ;;  %v54_v21 = vld [vmem:[%s569_s1 + $0x50] sm:$0xff]  ;;  %v55_v22 = vld [vmem:[%s569_s1 + $0x58] sm:$0xff] }
   0xc   :  { %v56_v23 = vld [vmem:[%s569_s1 + $0x60] sm:$0xff]  ;;  %v57_v24 = vld [vmem:[%s569_s1 + $0x68] sm:$0xff]  ;;  %v58_v25 = vld [vmem:[%s569_s1 + $0x70] sm:$0xff] }
   0xd   :  { %v59_v26 = vld [vmem:[%s569_s1 + $0x78] sm:$0xff]  ;;  %v60_v27 = vld [vmem:[%s569_s1 + $0x80] sm:$0xff]  ;;  %v61_v28 = vld [vmem:[%s569_s1 + $0x88] sm:$0xff] }
   0xe   :  { %v62_v29 = vld [vmem:[%s569_s1 + $0x90] sm:$0xff]  ;;  %v63_v30 = vld [vmem:[%s569_s1 + $0x98] sm:$0xff]  ;;  %v64_v31 = vld [vmem:[%s569_s1 + $0xa0] sm:$0xff] }
   0xf   :  { %v396_v11 = vpop.eup %325  ;;  %v65_v32 = vld [vmem:[%s569_s1 + $0xa8] sm:$0xff]  ;;  %v66_v33 = vld [vmem:[%s569_s1 + $0xb0] sm:$0xff]  ;;  %v67_v34 = vld [vmem:[%s569_s1 + $0xb8] sm:$0xff] }
  0x10   :  { %v398_v12 = vpop.eup %327  ;;  %32 = vrot.lane.b32.xlu1 %v396_v11, %s358_s0  ;;  %v68_v35 = vld [vmem:[%s569_s1 + $0xc0] sm:$0xff]  ;;  %v69_v36 = vld [vmem:[%s569_s1 + $0xc8] sm:$0xff]  ;;  %v70_v37 = vld [vmem:[%s569_s1 + $0xd0] sm:$0xff] }
  0x11   :  { %v330_v13 = vpop.eup %329  ;;  %v71_v38 = vld [vmem:[%s569_s1 + $0xd8] sm:$0xff]  ;;  %v72_v39 = vld [vmem:[%s569_s1 + $0xe0] sm:$0xff]  ;;  %v73_v40 = vld [vmem:[%s569_s1 + $0xe8] sm:$0xff] }
  0x12   :  { %24 = vrot.lane.b32.xlu0 %v330_v13, %s359_s21  ;;  %v332_v14 = vpop.eup %331  ;;  %v74_v41 = vld [vmem:[%s569_s1 + $0xf0] sm:$0xff]  ;;  %v75_v42 = vld [vmem:[%s569_s1 + $0xf8] sm:$0xff]  ;;  %s360_s1 = smov [#allocation2]  }
  0x14   :  { %34 = vrot.lane.b32.xlu1 %v398_v12, %s358_s0  ;;  %s306_s0 = sshll.u32 %s360_s1, 4  ;;  %s307_s0 = int_to_ptr.vmem [resolvable:$true] %s306_s0 }
  0x15   :  { %p338_p1 = scmp.lt.s32.totalorder %s307_s0, %s307_s0 }
  0x16   :  { %26 = vrot.lane.b32.xlu0 %v332_v14, %s359_s21  ;;  %s333_s21 = scalar_lea.vmem %s307_s0, 4096 }
  0x17   :  { %p334_p0 = scmp.ne.s32.totalorder %s307_s0, %s333_s21  ;;  %p339_p2 = scmp.lt.s32.totalorder %s333_s21, %s333_s21 }
  0x18   :  { %98 = vperm.xlu1 %324, %v48_v15  }
  0x19   :  { %p340_p3 = por %p339_p2, %p338_p1 }
  0x1a   :  { %103 = vperm.xlu0 %323, %v49_v16  }
  0x1b   :  { %p341_p4 = pnand %p340_p3, %p334_p0 }
  0x1c   :  { %108 = vperm.xlu1 %324, %v50_v17  }
  0x1e   :  { %113 = vperm.xlu0 %323, %v51_v18  }
  0x20   :  { %118 = vperm.xlu1 %324, %v52_v19  }
  0x22   :  { %123 = vperm.xlu0 %323, %v53_v20  }
  0x24   :  { %128 = vperm.xlu1 %324, %v54_v21  }
  0x26   :  { %133 = vperm.xlu0 %323, %v55_v22  }
  0x28   :  { %138 = vperm.xlu1 %324, %v56_v23  }
  0x2a   :  { %143 = vperm.xlu0 %323, %v57_v24  }
  0x2c   :  { %148 = vperm.xlu1 %324, %v58_v25  }
  0x2e   :  { %153 = vperm.xlu0 %323, %v59_v26  }
  0x30   :  { %158 = vperm.xlu1 %324, %v60_v27  }
  0x32   :  { %163 = vperm.xlu0 %323, %v61_v28  }
  0x34   :  { %168 = vperm.xlu1 %324, %v62_v29  }
  0x36   :  { %173 = vperm.xlu0 %323, %v63_v30  }
  0x38   :  { %178 = vperm.xlu1 %324, %v64_v31  }
  0x3a   :  { %183 = vperm.xlu0 %323, %v65_v32  }
  0x3c   :  { %188 = vperm.xlu1 %324, %v66_v33  }
  0x3e   :  { %193 = vperm.xlu0 %323, %v67_v34  }
  0x40   :  { %198 = vperm.xlu1 %324, %v68_v35  }
  0x42   :  { %203 = vperm.xlu0 %323, %v69_v36  }
  0x44   :  { %208 = vperm.xlu1 %324, %v70_v37  }
  0x46   :  { %213 = vperm.xlu0 %323, %v71_v38  }
  0x48   :  { %218 = vperm.xlu1 %324, %v72_v39  }
  0x4a   :  { %223 = vperm.xlu0 %323, %v73_v40  }
  0x4c   :  { %228 = vperm.xlu1 %324, %v74_v41  }
  0x4e   :  { %233 = vperm.xlu0 %323, %v75_v42  }
  0x81   :  { %v84_v43 = vpop.permute.xlu1 %83  ;;  %v79_v44 = vpop.permute.xlu0 %78 }
  0x85   :  { %v89_v45 = vpop.permute.xlu1 %88  ;;  %v94_v46 = vpop.permute.xlu0 %93 }
  0x89   :  { %v25_v47 = vpop.permute.xlu0 %24  ;;  %v33_v48 = vpop.permute.xlu1 %32 }
  0x8a   :  { %v39_v49 = vsel %vm38_vm0, %v396_v11, %v25_v47 }
  0x8b   :  { %v487_v50 = vsel %vm41_vm1, %v39_v49, %v33_v48 }
  0x8c   :  { %v236_v51 = vadd.f32 %v79_v44, %v487_v50  ;;  %v238_v52 = vadd.f32 %v89_v45, %v487_v50 }
  0x8d   :  { %v27_v53 = vpop.permute.xlu0 %26  ;;  %v35_v54 = vpop.permute.xlu1 %34 }
  0x8e   :  { %269 = vst.msk [vmem:[#allocation2] sm:$0xff] %vm268_vm2, %v236_v51  ;;  %271 = vst.msk [vmem:[#allocation2 + $0x10] sm:$0xff] %vm268_vm2, %v238_v52  ;;  %v40_v55 = vsel %vm38_vm0, %v398_v12, %v27_v53 }
  0x8f   :  { %v494_v56 = vsel %vm41_vm1, %v40_v55, %v35_v54 }
  0x90   :  { %v237_v57 = vadd.f32 %v84_v43, %v494_v56  ;;  %v239_v58 = vadd.f32 %v94_v46, %v494_v56 }
  0x92   :  { %270 = vst.msk [vmem:[#allocation2 + $0x8] sm:$0xff] %vm268_vm2, %v237_v57  ;;  %272 = vst.msk [vmem:[#allocation2 + $0x18] sm:$0xff] %vm268_vm2, %v239_v58 }
  0x97   :  { %v99_v59 = vpop.permute.xlu1 %98 }
  0x98   :  { %v240_v60 = vadd.f32 %v99_v59, %v487_v50 }
  0x99   :  { %v104_v61 = vpop.permute.xlu0 %103 }
  0x9a   :  { %273 = vst.msk [vmem:[#allocation2 + $0x20] sm:$0xff] %vm268_vm2, %v240_v60  ;;  %v241_v62 = vadd.f32 %v104_v61, %v494_v56 }
  0x9b   :  { %v109_v63 = vpop.permute.xlu1 %108 }
  0x9c   :  { %274 = vst.msk [vmem:[#allocation2 + $0x28] sm:$0xff] %vm268_vm2, %v241_v62  ;;  %v242_v0 = vadd.f32 %v109_v63, %v487_v50 }
  0x9d   :  { %v114_v1 = vpop.permute.xlu0 %113 }
  0x9e   :  { %275 = vst.msk [vmem:[#allocation2 + $0x30] sm:$0xff] %vm268_vm2, %v242_v0  ;;  %v243_v2 = vadd.f32 %v114_v1, %v494_v56 }
  0x9f   :  { %v119_v3 = vpop.permute.xlu1 %118 }
  0xa0   :  { %276 = vst.msk [vmem:[#allocation2 + $0x38] sm:$0xff] %vm268_vm2, %v243_v2  ;;  %v244_v4 = vadd.f32 %v119_v3, %v487_v50 }
  0xa1   :  { %v124_v5 = vpop.permute.xlu0 %123 }
  0xa2   :  { %277 = vst.msk [vmem:[#allocation2 + $0x40] sm:$0xff] %vm268_vm2, %v244_v4  ;;  %v245_v6 = vadd.f32 %v124_v5, %v494_v56 }
  0xa3   :  { %v129_v7 = vpop.permute.xlu1 %128 }
  0xa4   :  { %278 = vst.msk [vmem:[#allocation2 + $0x48] sm:$0xff] %vm268_vm2, %v245_v6  ;;  %v246_v8 = vadd.f32 %v129_v7, %v487_v50 }
  0xa5   :  { %v134_v9 = vpop.permute.xlu0 %133 }
  0xa6   :  { %279 = vst.msk [vmem:[#allocation2 + $0x50] sm:$0xff] %vm268_vm2, %v246_v8  ;;  %v247_v10 = vadd.f32 %v134_v9, %v494_v56 }
  0xa7   :  { %v139_v11 = vpop.permute.xlu1 %138 }
  0xa8   :  { %280 = vst.msk [vmem:[#allocation2 + $0x58] sm:$0xff] %vm268_vm2, %v247_v10  ;;  %v248_v12 = vadd.f32 %v139_v11, %v487_v50 }
  0xa9   :  { %v144_v13 = vpop.permute.xlu0 %143 }
  0xaa   :  { %281 = vst.msk [vmem:[#allocation2 + $0x60] sm:$0xff] %vm268_vm2, %v248_v12  ;;  %v249_v14 = vadd.f32 %v144_v13, %v494_v56 }
  0xab   :  { %v149_v15 = vpop.permute.xlu1 %148 }
  0xac   :  { %282 = vst.msk [vmem:[#allocation2 + $0x68] sm:$0xff] %vm268_vm2, %v249_v14  ;;  %v250_v16 = vadd.f32 %v149_v15, %v487_v50 }
  0xad   :  { %v154_v17 = vpop.permute.xlu0 %153 }
  0xae   :  { %283 = vst.msk [vmem:[#allocation2 + $0x70] sm:$0xff] %vm268_vm2, %v250_v16  ;;  %v251_v18 = vadd.f32 %v154_v17, %v494_v56 }
  0xaf   :  { %v159_v19 = vpop.permute.xlu1 %158 }
  0xb0   :  { %284 = vst.msk [vmem:[#allocation2 + $0x78] sm:$0xff] %vm268_vm2, %v251_v18  ;;  %v252_v20 = vadd.f32 %v159_v19, %v487_v50 }
  0xb1   :  { %v164_v21 = vpop.permute.xlu0 %163 }
  0xb2   :  { %285 = vst.msk [vmem:[#allocation2 + $0x80] sm:$0xff] %vm268_vm2, %v252_v20  ;;  %v253_v22 = vadd.f32 %v164_v21, %v494_v56 }
  0xb3   :  { %v169_v23 = vpop.permute.xlu1 %168 }
  0xb4   :  { %286 = vst.msk [vmem:[#allocation2 + $0x88] sm:$0xff] %vm268_vm2, %v253_v22  ;;  %v254_v24 = vadd.f32 %v169_v23, %v487_v50 }
  0xb5   :  { %v174_v25 = vpop.permute.xlu0 %173 }
  0xb6   :  { %287 = vst.msk [vmem:[#allocation2 + $0x90] sm:$0xff] %vm268_vm2, %v254_v24  ;;  %v255_v26 = vadd.f32 %v174_v25, %v494_v56 }
  0xb7   :  { %v179_v27 = vpop.permute.xlu1 %178 }
  0xb8   :  { %288 = vst.msk [vmem:[#allocation2 + $0x98] sm:$0xff] %vm268_vm2, %v255_v26  ;;  %v256_v28 = vadd.f32 %v179_v27, %v487_v50 }
  0xb9   :  { %v184_v29 = vpop.permute.xlu0 %183 }
  0xba   :  { %289 = vst.msk [vmem:[#allocation2 + $0xa0] sm:$0xff] %vm268_vm2, %v256_v28  ;;  %v257_v30 = vadd.f32 %v184_v29, %v494_v56 }
  0xbb   :  { %v189_v31 = vpop.permute.xlu1 %188 }
  0xbc   :  { %290 = vst.msk [vmem:[#allocation2 + $0xa8] sm:$0xff] %vm268_vm2, %v257_v30  ;;  %v258_v32 = vadd.f32 %v189_v31, %v487_v50 }
  0xbd   :  { %v194_v33 = vpop.permute.xlu0 %193 }
  0xbe   :  { %291 = vst.msk [vmem:[#allocation2 + $0xb0] sm:$0xff] %vm268_vm2, %v258_v32  ;;  %v259_v34 = vadd.f32 %v194_v33, %v494_v56 }
  0xbf   :  { %v199_v35 = vpop.permute.xlu1 %198 }
  0xc0   :  { %292 = vst.msk [vmem:[#allocation2 + $0xb8] sm:$0xff] %vm268_vm2, %v259_v34  ;;  %v260_v36 = vadd.f32 %v199_v35, %v487_v50 }
  0xc1   :  { %v204_v37 = vpop.permute.xlu0 %203 }
  0xc2   :  { %293 = vst.msk [vmem:[#allocation2 + $0xc0] sm:$0xff] %vm268_vm2, %v260_v36  ;;  %v261_v38 = vadd.f32 %v204_v37, %v494_v56 }
  0xc3   :  { %v209_v39 = vpop.permute.xlu1 %208 }
  0xc4   :  { %294 = vst.msk [vmem:[#allocation2 + $0xc8] sm:$0xff] %vm268_vm2, %v261_v38  ;;  %v262_v40 = vadd.f32 %v209_v39, %v487_v50 }
  0xc5   :  { %v214_v41 = vpop.permute.xlu0 %213 }
  0xc6   :  { %295 = vst.msk [vmem:[#allocation2 + $0xd0] sm:$0xff] %vm268_vm2, %v262_v40  ;;  %v263_v42 = vadd.f32 %v214_v41, %v494_v56 }
  0xc7   :  { %v219_v43 = vpop.permute.xlu1 %218 }
  0xc8   :  { %296 = vst.msk [vmem:[#allocation2 + $0xd8] sm:$0xff] %vm268_vm2, %v263_v42  ;;  %v264_v44 = vadd.f32 %v219_v43, %v487_v50 }
  0xc9   :  { %v224_v45 = vpop.permute.xlu0 %223 }
  0xca   :  { %297 = vst.msk [vmem:[#allocation2 + $0xe0] sm:$0xff] %vm268_vm2, %v264_v44  ;;  %v265_v46 = vadd.f32 %v224_v45, %v494_v56 }
  0xcb   :  { %v229_v47 = vpop.permute.xlu1 %228 }
  0xcc   :  { %298 = vst.msk [vmem:[#allocation2 + $0xe8] sm:$0xff] %vm268_vm2, %v265_v46  ;;  %v266_v48 = vadd.f32 %v229_v47, %v487_v50 }
  0xcd   :  { %v234_v49 = vpop.permute.xlu0 %233 }
  0xce   :  { %299 = vst.msk [vmem:[#allocation2 + $0xf0] sm:$0xff] %vm268_vm2, %v266_v48  ;;  %v267_v51 = vadd.f32 %v234_v49, %v494_v56 }
  0xd0   :  { %300 = vst.msk [vmem:[#allocation2 + $0xf8] sm:$0xff] %vm268_vm2, %v267_v51 }
  0xd1   :  { %344 = shalt.err (!%p341_p4)
}
  0xd2   :  { %s345_s24 = scalar_lea.hbm %s570_s2, 4096 }
  0xd3   :  { %p346_p5 = scmp.ne.s32.totalorder %s570_s2, %s345_s24  ;;  %p349_p6 = scmp.lt.u32.totalorder %s345_s24, %s570_s2 }
  0xd5   :  { %p351_p7 = pnand %p349_p6, %p346_p5 }
  0xd7   :  { %354 = shalt.err (!%p351_p7)
}
  0xd8   :  { %s361_s29 = smov 128   ;;  %s362_s30 = smov 8  }
  0xd9   :  { %312 = dma.vmem_to_hbm [thread:$0]  %s307_s0, 4096, %s570_s2, [#allocation3], %s361_s29, %s361_s29, %s362_s30  }
  0xda   :  { %355 = dma.done.wait [#allocation3], 4096  }
  0xdb   :  { %356 = vsyncadd [#allocation3], 4294963200 }
  0xdc   :  { %316 = vsyncpa [#allocation3], 1 }

</bundles_post_ra>
